<compile_context>
chip_gen: v5e
topology: v5e:2x2
jax: 0.10.0
libtpu: 0.0.40
codegen_flags: <defaults>
</compile_context>

<pallas_src>
import functools

import jax
import jax.numpy as jnp
from jax import lax
from jax.experimental import pallas as pl
from jax.experimental.pallas import tpu as pltpu


def _pow_static(x, p):
    """x ** p. VPU-only multiplies when p is a small positive integer."""
    pf = float(p)
    if pf == int(pf) and 1 <= int(pf) <= 8:
        n = int(pf)
        out = x
        for _ in range(n - 1):
            out = out * x
        return out
    return x ** pf  # generic EUP (exp/log) path for non-integer p


def _root_static(m, p):
    """m ** (1/p); only applied to the tiny per-tile accumulator result."""
    pf = float(p)
    if pf == 1.0:
        return m
    if pf == 2.0:
        return jnp.sqrt(m)
    return m ** (1.0 / pf)


def _gem_kernel(x_ref, o_ref, acc_ref, *, p, eps, hw_total, block_hw, needs_mask):
    # x_ref:   (1, bc, bhw) block of (B, C, HW), native input dtype
    # o_ref:   (1, bc, 1)   block of (B, C, 1), input dtype
    # acc_ref: (bc, bhw)    f32 VMEM scratch, persistent across HW chunks
    hi = pl.program_id(2)

    @pl.when(hi == 0)
    def _init():
        acc_ref[...] = jnp.zeros_like(acc_ref)

    x = x_ref[0].astype(jnp.float32)      # (bc, bhw); cast per-tile, not in HBM
    x = jnp.maximum(x, eps)               # clamp(min=eps)
    xp = _pow_static(x, p)                # VPU multiplies for integer p

    if needs_mask:
        offs = hi * block_hw + lax.broadcasted_iota(jnp.int32, xp.shape, 1)
        xp = jnp.where(offs < hw_total, xp, 0.0)

    # Bulk of the spatial reduction: elementwise VPU accumulation.
    acc_ref[...] += xp

    @pl.when(hi == pl.num_programs(2) - 1)
    def _finalize():
        # Single small cross-lane (XLU) reduce per (b, c-tile).
        s = jnp.sum(acc_ref[...], axis=-1, keepdims=True)       # (bc, 1)
        m = s * (1.0 / float(hw_total))                          # true mean
        res = _root_static(m, p).astype(o_ref.dtype)             # (bc, 1)
        o_ref[...] = res[None]                                   # (1, bc, 1)


def gem_pool(x, p: float = 3.0, eps: float = 1e-6):
    """GeM pooling over dims (2, 3): (B, C, H, W) -> (B, C)."""
    B, C, H, W = x.shape
    HW = H * W
    x_flat = x.reshape(B, C, HW)

    # Channel tile: multiple of 8 (sublane) or the full C dimension.
    if C % 8 == 0:
        bc = min(C, 1024)
    else:
        bc = C

    # Spatial tile: multiple of 128 (lane) or the full HW dimension.
    if HW % 128 == 0:
        bhw = min(HW, 512)
    elif HW <= 1024:
        bhw = HW
    else:
        bhw = 512  # ragged tail handled by in-kernel masking

    n_c = (C + bc - 1) // bc
    n_hw = (HW + bhw - 1) // bhw
    needs_mask = (HW % bhw) != 0

    kernel = functools.partial(
        _gem_kernel,
        p=float(p),
        eps=float(eps),
        hw_total=HW,
        block_hw=bhw,
        needs_mask=needs_mask,
    )

    grid_spec = pltpu.PrefetchScalarGridSpec(
        num_scalar_prefetch=0,
        grid=(B, n_c, n_hw),
        in_specs=[
            pl.BlockSpec((1, bc, bhw), lambda b, ci, hi: (b, ci, hi)),
        ],
        out_specs=pl.BlockSpec((1, bc, 1), lambda b, ci, hi: (b, ci, 0)),
        scratch_shapes=[pltpu.VMEM((bc, bhw), jnp.float32)],
    )

    out3 = pl.pallas_call(
        kernel,
        out_shape=jax.ShapeDtypeStruct((B, C, 1), x.dtype),
        grid_spec=grid_spec,
        compiler_params=pltpu.CompilerParams(
            dimension_semantics=("parallel", "parallel", "arbitrary"),
            vmem_limit_bytes=32 * 1024 * 1024,
        ),
    )(x_flat)
    return out3.reshape(B, C)


def gem_reference(x, p: float = 3.0, eps: float = 1e-6):
    x = jnp.maximum(x, eps)  # clamp(min=eps)
    return jnp.mean(x ** p, axis=(2, 3)) ** (1.0 / p)


if __name__ == "__main__":
    key = jax.random.PRNGKey(0)

    # Primary test: default GeM config, small NCHW input.
    B, C, H, W = 2, 4, 16, 16
    x = jax.random.uniform(key, (B, C, H, W), dtype=jnp.float32)

    out = gem_pool(x, p=3.0, eps=1e-6)
    out = jax.block_until_ready(out)
    ref = gem_reference(x, p=3.0, eps=1e-6)
    assert out.shape == (B, C)
    assert jnp.allclose(out, ref, atol=1e-5, rtol=1e-5), "mismatch vs reference"

    # Secondary test: exercises the ragged-HW masked path (HW = 33*33 = 1089).
    key2 = jax.random.PRNGKey(1)
    x2 = jax.random.uniform(key2, (2, 8, 33, 33), dtype=jnp.float32)
    out2 = jax.block_until_ready(gem_pool(x2, p=3.0, eps=1e-6))
    ref2 = gem_reference(x2, p=3.0, eps=1e-6)
    assert out2.shape == (2, 8)
    assert jnp.allclose(out2, ref2, atol=1e-5, rtol=1e-5), "mismatch (masked path)"

    print("KERNEL_OK")
</pallas_src>

<mosaic_0001>
module attributes {stable_mosaic.version = 11 : i64} {
  func.func @_gem_kernel(%arg0: i32, %arg1: i32, %arg2: i32, %arg3: memref<1x4x256xf32, #tpu.memory_space<vmem>>, %arg4: memref<1x4x1xf32, #tpu.memory_space<vmem>>, %arg5: memref<4x256xf32, #tpu.memory_space<vmem>>) attributes {dimension_semantics = [#tpu.dimension_semantics<parallel>, #tpu.dimension_semantics<parallel>, #tpu.dimension_semantics<arbitrary>], iteration_bounds = array<i64: 2, 1, 1>, scalar_prefetch = 0 : i64, scratch_operands = 1 : i64, tpu.core_type = #tpu.core_type<tc>, window_params = [{transform_indices = @transform_0, window_bounds = array<i64: 1, 4, 256>}, {transform_indices = @transform_1, window_bounds = array<i64: 1, 4, 1>}]} {
    %c0_i32 = arith.constant 0 : i32
    %0 = arith.cmpi eq, %arg2, %c0_i32 : i32
    %1 = arith.extui %0 : i1 to i32
    %c0_i32_0 = arith.constant 0 : i32
    %2 = arith.cmpi ne, %1, %c0_i32_0 : i32
    scf.if %2 {
      %cst_9 = arith.constant 0.000000e+00 : f32
      %15 = vector.broadcast %cst_9 : f32 to vector<4x256xf32>
      %c0_10 = arith.constant 0 : index
      %c0_11 = arith.constant 0 : index
      %16 = vector.load %arg5[%c0_10, %c0_11] : memref<4x256xf32, #tpu.memory_space<vmem>>, vector<4x256xf32>
      tpu.vector_store %arg5[%c0_10, %c0_11], %15 {strides = array<i32>} : memref<4x256xf32, #tpu.memory_space<vmem>>, vector<4x256xf32>,
    } else {
    }
    %c0 = arith.constant 0 : index
    %c0_1 = arith.constant 0 : index
    %c0_2 = arith.constant 0 : index
    %3 = vector.load %arg3[%c0, %c0_1, %c0_2] : memref<1x4x256xf32, #tpu.memory_space<vmem>>, vector<1x4x256xf32>
    %4 = vector.shape_cast %3 : vector<1x4x256xf32> to vector<4x256xf32>
    %cst = arith.constant 9.99999997E-7 : f32
    %5 = vector.broadcast %cst : f32 to vector<4x256xf32>
    %6 = arith.maximumf %4, %5 : vector<4x256xf32>
    %7 = arith.mulf %6, %6 : vector<4x256xf32>
    %8 = arith.mulf %7, %6 : vector<4x256xf32>
    %c0_3 = arith.constant 0 : index
    %c0_4 = arith.constant 0 : index
    %9 = vector.load %arg5[%c0_3, %c0_4] : memref<4x256xf32, #tpu.memory_space<vmem>>, vector<4x256xf32>
    %10 = arith.addf %9, %8 : vector<4x256xf32>
    %c0_5 = arith.constant 0 : index
    %c0_6 = arith.constant 0 : index
    %11 = vector.load %arg5[%c0_5, %c0_6] : memref<4x256xf32, #tpu.memory_space<vmem>>, vector<4x256xf32>
    tpu.vector_store %arg5[%c0_5, %c0_6], %10 {strides = array<i32>} : memref<4x256xf32, #tpu.memory_space<vmem>>, vector<4x256xf32>,
    %c0_i32_7 = arith.constant 0 : i32
    %12 = arith.cmpi eq, %arg2, %c0_i32_7 : i32
    %13 = arith.extui %12 : i1 to i32
    %c0_i32_8 = arith.constant 0 : i32
    %14 = arith.cmpi ne, %13, %c0_i32_8 : i32
    scf.if %14 {
      %c0_9 = arith.constant 0 : index
      %c0_10 = arith.constant 0 : index
      %15 = vector.load %arg5[%c0_9, %c0_10] : memref<4x256xf32, #tpu.memory_space<vmem>>, vector<4x256xf32>
      %cst_11 = arith.constant dense<0.000000e+00> : vector<4xf32>
      %16 = vector.multi_reduction <add>, %15, %cst_11 [1] : vector<4x256xf32> to vector<4xf32>
      %17 = vector.shape_cast %16 : vector<4xf32> to vector<4x1xf32>
      %cst_12 = arith.constant 3.906250e-03 : f32
      %18 = vector.broadcast %cst_12 : f32 to vector<4x1xf32>
      %19 = arith.mulf %17, %18 : vector<4x1xf32>
      %cst_13 = arith.constant 0.333333343 : f32
      %20 = vector.broadcast %cst_13 : f32 to vector<4x1xf32>
      %21 = math.powf %19, %20 : vector<4x1xf32>
      %22 = vector.shape_cast %21 : vector<4x1xf32> to vector<1x4x1xf32>
      %c0_14 = arith.constant 0 : index
      %c0_15 = arith.constant 0 : index
      %c0_16 = arith.constant 0 : index
      %23 = vector.load %arg4[%c0_14, %c0_15, %c0_16] : memref<1x4x1xf32, #tpu.memory_space<vmem>>, vector<1x4x1xf32>
      tpu.vector_store %arg4[%c0_14, %c0_15, %c0_16], %22 {strides = array<i32>} : memref<1x4x1xf32, #tpu.memory_space<vmem>>, vector<1x4x1xf32>,
    } else {
    }
    return
  }
  func.func @transform_0(%arg0: i32, %arg1: i32, %arg2: i32) -> (i32, i32, i32) {
    %c0_i32 = arith.constant 0 : i32
    return %arg0, %arg1, %arg2 : i32, i32, i32
  }
  func.func @transform_1(%arg0: i32, %arg1: i32, %arg2: i32) -> (i32, i32, i32) {
    %c0_i32 = arith.constant 0 : i32
    %c0_i32_0 = arith.constant 0 : i32
    return %arg0, %arg1, %c0_i32 : i32, i32, i32
  }
}

</mosaic_0001>

<bundles_post_ra>
// kernel: tpu_custom_call.1
= control target key start
LH: loop header
LB: loop body
LE: loop exit
PB: predicated region body
PF: predicated region fallthrough
CT: control target
= control target key end

     0   :  { %6 = vsyncpa [#allocation4], 0  ;;  %s570_s0 = inlined_call_operand.hbm [shape: f32[2,4,256], index: 0, kind: input, shape index: {}]   ;;  %s571_s1 = inlined_call_operand.vmem [shape: f32[2,4,1], index: 1, kind: output, shape index: {}]  }
   0x1   :  { %8 = vsyncpa [#allocation4 + $0x1], 0  ;;  %s482_s6 = smov 0   ;;  %s484_s7 = smov 0  }
   0x2   :  { %s486_s8 = smov 0   ;;  %s488_s9 = smov 0  }
   0x3   :  { %s490_s10 = smov 0   ;;  %s492_s11 = smov 0  }
   0x4 LB: > { %s294_s12 = sadd.s32 4294967295, %s470_s11   ;;  %s33_s13 = sadd.s32 1, %s466_s10  ;;  %s470_s11 = sphi %s492_s11, %s14_s11   ;;  %s466_s10 = sphi %s490_s10, %s578_s10   ;;  %s462_s9 = sphi %s488_s9, %s577_s9   ;;  %s458_s8 = sphi %s486_s8, %s576_s8   ;;  %s454_s7 = sphi %s484_s7, %s575_s7   ;;  %s450_s6 = sphi %s482_s6, %s574_s6  }
   0x5   : > { %p35_p0 = scmp.ge.s32.totalorder %s33_s13, 2  ;;  %s44_s14 = sadd.s32 1, %s458_s8 }
   0x6   : > { %p51_p1 = scmp.ne.s32.totalorder %s458_s8, %s454_s7  ;;  %p52_p2 = scmp.eq.s32.totalorder %s470_s11, 0 }
   0x7   : > { %s580_s13 = smov (%p35_p0, %s33_s13), 0  ;;  %p57_p4 = scmp.ne.s32.totalorder %s454_s7, %s450_s6 }
   0x8   : > { %p518_p3 = por %p52_p2, %p51_p1  ;;  %s37_s16 = ssub.s32 %s466_s10, %s580_s13 }
   0x9   : > { %p58_p5 = scmp.eq.s32.totalorder %s294_s12, 0  ;;  %p42_p6 = scmp.eq.s32.totalorder %s37_s16, 0 }
   0xa   : > { %p337_p8 = scmp.lt.s32.totalorder %s470_s11, 2  ;;  %s109_s19 = sand.u32 1, %s458_s8  }
   0xb   : > { %p525_p7 = por %p58_p5, %p57_p4  ;;  %s306_s20 = sshll.u32 %s466_s10, 3 }
   0xc   : > { %s531_s18 = scalar_select %p42_p6, %s458_s8, %s44_s14  }
   0xd   : > { %s298_s21 = sshll.u32 %s109_s19, 3  ;;  %s122_s24 = scalar_lea.hbm %s570_s0, %s306_s20 }
   0xe   : > { %s124_s25 = sshll.u32 %s122_s24, 4  ;;  %s113_s26 = scalar_lea.vmem [#allocation3], %s298_s21  ;;  %s125_s25 = int_to_ptr.hbm [resolvable:$true] %s124_s25 }
   0xf   : > { %s126_s27 = sshll.u32 %s113_s26, 4  ;;  %p334_p9 = pnand %p337_p8, %p518_p3  ;;  %s127_s27 = int_to_ptr.vmem [resolvable:$true] %s126_s27 }
  0x10   : > { %p301_p10 = scmp.ge.s32.totalorder %s470_s11, 1  ;;  %p131_p11 = scmp.lt.s32.totalorder %s470_s11, 3 }
  0x11   : > { %s110_s28 = scalar_lea.sflag [#allocation4], %s109_s19 }
  0x12   : > { %336 = dma.hbm_to_vmem [thread:$0]  (!%p334_p9), %s125_s25, 128, %s127_s27, %s110_s28  }
  0x13   : > { %p132_p12 = pnand %p301_p10, %p131_p11 }
  0x14   : > { %s137_s29 = sand.u32 (!%p132_p12), 1, %s454_s7  }
  0x15   : > { %135 = sbr.rel (%p132_p12) target bundleno = 203 (0xcb), region = 24  ;;  %s302_s30 = sshll.u32 (!%p132_p12), %s137_s29, 3 }
  0x16   : > { %s138_s2 = scalar_lea.sflag (!%p132_p12), [#allocation4], %s137_s29  ;;  %s141_s3 = scalar_lea.vmem (!%p132_p12), [#allocation3], %s302_s30 }
  0x1a   : > { %445 = dma.done.wait (%p525_p7), %s138_s2, 128  }
  0x1b   : > { %447 = vsyncadd (%p525_p7), %s138_s2, 4294967168  ;;  %v176_v0 = vld [vmem:[%s141_s3] sm:$0xff]  ;;  %vm193_vm0 = vcmask 1043456   ;;  %p164_p13 = scmp.lt.s32.totalorder %s462_s9, 1  ;;  %vm201_vm5 = vcmask 3072  }
  0x1c   : > { %v177_v1 = vmax.f32 %v176_v0, 1e-06 }
  0x1d   : > { %s582_s9 = smov (!%p164_p13, %s462_s9), 1 }
  0x1e   : > { %v178_v2 = vmul.f32 %v177_v1, %v177_v1  ;;  %s303_s4 = sshll.u32 %s582_s9, 2 }
  0x1f   : > { %s170_s12 = scalar_lea.vmem %s571_s1, %s303_s4 }
  0x20   : > { %v179_v3 = vmul.f32 %v178_v2, %v177_v1 }
  0x22   : > { %188 = vst [vmem:[#allocation1] ss:$2 sm:$0xff] %v179_v3 }
  0x29   : > { %v189_v4 = vld.sshfl [vmem:[#allocation1] sm:$0xff pattern:$0x75316420]  ;;  %v190_v5 = vld.sshfl [vmem:[#allocation1 + $0x8] sm:$0xff pattern:$0x75316420] }
  0x2a   : > { %v194_v6 = vsel %vm193_vm0, %v189_v4, 0.0  ;;  %v195_v7 = vsel %vm193_vm0, %v190_v5, 0.0 }
  0x2b   : > { %v196_v8 = vadd.f32 %v195_v7, %v194_v6 }
  0x2d   : > { %197 = vadd.xlane.f32.xlu0 %v196_v8 }
  0xa0   : > { %v198_v9 = vpop.xlane.xlu0 %197 }
  0xa1   : > { %v199_v10 = vmul.f32 0.00390625, %v198_v9 }
  0xa3   : > { %v309_v11 = vand.u32 2147483647, %v199_v10  ;;  %v326_v23 = vand.u32 2147483648, %v199_v10  ;;  %vm308_vm3 = vcmp.lt.f32.partialorder %v199_v10, 0.0  ;;  %vm307_vm4 = vcmp.eq.f32.partialorder %v199_v10, 0.0 }
  0xa5   : > { %386 = vlog2.f32 %v309_v11  ;;  %vm323_vm1 = vweird.f32 %v309_v11  ;;  %vm325_vm2 = vcmp.eq.f32.partialorder %v309_v11, 0.0  ;;  %vm310_vm6 = vcmp.eq.f32.partialorder %v309_v11, inf }
  0xab   : > { %v387_v12 = vpop.eup %386 }
  0xac   : > { %v313_v13 = vmul.f32 -0.33333334, %v387_v12 }
  0xae   : > { %388 = vpow2.f32 %v313_v13 }
  0xb4   : > { %v389_v14 = vpop.eup %388 }
  0xb5   : > { %v315_v15 = vmul.f32 %v389_v14, %v389_v14 }
  0xb7   : > { %v316_v16 = vmul.f32 %v315_v15, %v309_v11 }
  0xb9   : > { %v317_v17 = vmul.f32 %v316_v16, %v315_v15 }
  0xbb   : > { %v318_v18 = vsub.f32 %v317_v17, %v389_v14 }
  0xbd   : > { %v319_v19 = vmul.f32 -0.33333334, %v318_v18 }
  0xbf   : > { %v320_v20 = vadd.f32 %v389_v14, %v319_v19 }
  0xc1   : > { %v321_v21 = vmul.f32 %v320_v20, %v199_v10 }
  0xc3   : > { %v322_v22 = vmul.f32 %v321_v21, %v320_v20 }
  0xc5   : > { %v324_v24 = vsel %vm323_vm1, %v199_v10, %v322_v22 }
  0xc6   : > { %v327_v25 = vsel %vm325_vm2, %v326_v23, %v324_v24 }
  0xc7   : > { %v328_v26 = vsel %vm308_vm3, nan, %v327_v25 }
  0xc8   : > { %v329_v27 = vsel %vm307_vm4, 0.0, %v328_v26 }
  0xc9   : > { %v330_v28 = vsel %vm310_vm6, inf, %v329_v27 }
  0xca   : > { %202 = vst.msk [vmem:[%s170_s12] sm:$0xf] %vm201_vm5, %v330_v28 }
  0xcb PF: > { %s14_s11 = sadd.s32 1, %s470_s11   ;;  %s574_s6 = smov %s454_s7 }
  0xcc   : > { %p11_p0 = scmp.ge.s32.totalorder %s14_s11, 4   ;;  %s575_s7 = smov %s458_s8 }
  0xcd   : > { %s576_s8 = smov %s531_s18  ;;  %s577_s9 = smov %s466_s10 }
  0xce   : > { %s578_s10 = smov %s580_s13  ;;  %13 = sbr.rel (!%p11_p0) target bundleno = 4 (0x4), region = 72 }
  0xd3   :  { %228 = vsyncpa [#allocation4], 1 }
  0xd4   :  { %230 = vsyncpa [#allocation4 + $0x1], 1 }

</bundles_post_ra>
